<compile_context>
chip_gen: v6e
topology: v6e:2x2x1
jax: 0.10.0
libtpu: 0.0.40
codegen_flags: <defaults>
</compile_context>

<pallas_src>
import jax
import jax.numpy as jnp
from jax.experimental import pallas as pl
from jax.experimental.pallas import tpu as pltpu

HIDDEN_SIZE = 50
INPUT_SIZE = 3
OUTPUT_SIZE = 1

LANE = 128      # vreg lane width
SUBLANE = 8     # f32 sublane count


def time_rnn_kernel(x_ref, whh_ref, packed_ref, bfc_ref, out_ref):
    """Whole forward pass in one invocation (everything fits in VMEM).

    x_ref      : (T*Bp, Dp)  time-major input, flattened in the wrapper so each
                             timestep is one sublane-tile-aligned row block
    whh_ref    : (Hp, Hp)    hidden->hidden weights (pre-transposed, zero-padded)
    packed_ref : (Dp+2, Hp)  rows [0:Dp]   = W_ih^T (zero-padded)
                             row  [Dp]     = b_ih + b_hh
                             row  [Dp+1]   = fc weight row
    bfc_ref    : (1,) SMEM   fc bias scalar
    out_ref    : (1, Bp)     lane-dense output row
    """
    TB, Dp = x_ref.shape
    Hp = whh_ref.shape[0]
    Bp = out_ref.shape[1]
    T = TB // Bp

    packed = packed_ref[...]
    wih = packed[:Dp, :]                # (Dp, Hp)
    bias = packed[Dp:Dp + 1, :]         # (1, Hp)  = b_ih + b_hh
    wfc = packed[Dp + 1:Dp + 2, :]      # (1, Hp)
    whh = whh_ref[...]                  # (Hp, Hp)

    # Hoisted input projection for all timesteps, bias folded in once; this is
    # the only full-size MXU pass and it is off the serial dependence chain.
    xw = jnp.dot(x_ref[...], wih, preferred_element_type=jnp.float32) + bias

    # Serial recurrence, fully unrolled over the compile-time-constant T: only
    # h @ W_hh and the tanh (EUP) remain on the critical path.
    h = jnp.zeros((Bp, Hp), jnp.float32)
    for t in range(T):
        h = jnp.tanh(xw[t * Bp:(t + 1) * Bp, :]
                     + jnp.dot(h, whh, preferred_element_type=jnp.float32))

    # Final (H -> 1) projection emitted as a lane-dense (1, Bp) row:
    # wfc (1,Hp) contracted with h (Bp,Hp) over Hp  ==  wfc @ h^T.
    row = jax.lax.dot_general(wfc, h, (((1,), (1,)), ((), ())),
                              preferred_element_type=jnp.float32)   # (1, Bp)
    out_ref[...] = row + bfc_ref[0]


def prepare_params(params):
    """One-time preprocessing: cast, transpose, zero-pad, pack.

    Zero padding on W_hh rows AND columns plus zero bias / fc padding keeps the
    phantom hidden units identically 0 (tanh(0) = 0), so they never affect the
    real ones.
    """
    assert params["w_fc"].shape == (OUTPUT_SIZE, HIDDEN_SIZE) and OUTPUT_SIZE == 1
    Hp = pl.cdiv(HIDDEN_SIZE, LANE) * LANE
    Dp = pl.cdiv(INPUT_SIZE, SUBLANE) * SUBLANE

    whh = jnp.zeros((Hp, Hp), jnp.float32)
    whh = whh.at[:HIDDEN_SIZE, :HIDDEN_SIZE].set(params["w_hh"].astype(jnp.float32).T)

    packed = jnp.zeros((Dp + 2, Hp), jnp.float32)
    packed = packed.at[:INPUT_SIZE, :HIDDEN_SIZE].set(params["w_ih"].astype(jnp.float32).T)
    packed = packed.at[Dp, :HIDDEN_SIZE].set(
        (params["b_ih"] + params["b_hh"]).astype(jnp.float32))
    packed = packed.at[Dp + 1, :HIDDEN_SIZE].set(params["w_fc"].astype(jnp.float32)[0])

    bfc = params["b_fc"].astype(jnp.float32).reshape((1,))
    return {"whh": whh, "packed": packed, "bfc": bfc}


@jax.jit
def time_rnn_forward(x, prep):
    """x: (B, T, D_in) float32 (batch_first, like the PyTorch module)."""
    B, T, Din = x.shape
    assert Din == INPUT_SIZE
    Bp = pl.cdiv(B, SUBLANE) * SUBLANE
    Dp = prep["packed"].shape[0] - 2

    # Per-call input prep only: time-major, zero-pad batch/feature, flatten to
    # a 2-D slab so the kernel never reshapes a narrow-lane array.
    x_tm = jnp.transpose(x.astype(jnp.float32), (1, 0, 2))          # (T, B, Din)
    x_tm = jnp.pad(x_tm, ((0, 0), (0, Bp - B), (0, Dp - Din)))      # (T, Bp, Dp)
    x2d = x_tm.reshape(T * Bp, Dp)

    vmem = pl.BlockSpec(memory_space=pltpu.MemorySpace.VMEM)
    smem = pl.BlockSpec(memory_space=pltpu.MemorySpace.SMEM)
    out_row = pl.pallas_call(
        time_rnn_kernel,
        out_shape=jax.ShapeDtypeStruct((1, Bp), jnp.float32),
        in_specs=[vmem, vmem, vmem, smem],
        out_specs=vmem,
    )(x2d, prep["whh"], prep["packed"], prep["bfc"])
    return out_row[0, :B].reshape(B, OUTPUT_SIZE)


def time_rnn_reference(x, params):
    """Pure-JAX reference matching PyTorch nn.RNN(batch_first=True) + Linear."""
    B, T, _ = x.shape
    h = jnp.zeros((B, HIDDEN_SIZE), jnp.float32)
    for t in range(T):
        h = jnp.tanh(x[:, t, :] @ params["w_ih"].T + params["b_ih"]
                     + h @ params["w_hh"].T + params["b_hh"])
    return h @ params["w_fc"].T + params["b_fc"]


def init_params(key):
    """Deterministic init; shapes mirror nn.RNN / nn.Linear parameters."""
    k = 1.0 / jnp.sqrt(jnp.float32(HIDDEN_SIZE))
    keys = jax.random.split(key, 6)
    u = lambda kk, shape: jax.random.uniform(kk, shape, jnp.float32, -k, k)
    return {
        "w_ih": u(keys[0], (HIDDEN_SIZE, INPUT_SIZE)),   # rnn.weight_ih_l0
        "w_hh": u(keys[1], (HIDDEN_SIZE, HIDDEN_SIZE)),  # rnn.weight_hh_l0
        "b_ih": u(keys[2], (HIDDEN_SIZE,)),              # rnn.bias_ih_l0
        "b_hh": u(keys[3], (HIDDEN_SIZE,)),              # rnn.bias_hh_l0
        "w_fc": u(keys[4], (OUTPUT_SIZE, HIDDEN_SIZE)),  # fc.weight
        "b_fc": u(keys[5], (OUTPUT_SIZE,)),              # fc.bias
    }


if __name__ == "__main__":
    key = jax.random.PRNGKey(0)
    k_x, k_p = jax.random.split(key)

    B, T = 2, 8
    x = jax.random.normal(k_x, (B, T, INPUT_SIZE), jnp.float32)
    params = init_params(k_p)

    prep = prepare_params(params)          # one-time, off the per-call path
    out = jax.block_until_ready(time_rnn_forward(x, prep))

    ref = time_rnn_reference(x, params)
    assert out.shape == (B, OUTPUT_SIZE)
    assert jnp.allclose(out, ref, atol=1e-5, rtol=1e-5), (out, ref)

    print("KERNEL_OK")
</pallas_src>

<mosaic_0001>
module attributes {stable_mosaic.version = 11 : i64} {
  func.func @time_rnn_kernel(%arg0: memref<64x8xf32, #tpu.memory_space<vmem>>, %arg1: memref<128x128xf32, #tpu.memory_space<vmem>>, %arg2: memref<10x128xf32, #tpu.memory_space<vmem>>, %arg3: memref<1xf32, #tpu.memory_space<smem>>, %arg4: memref<1x8xf32, #tpu.memory_space<vmem>>) attributes {dimension_semantics = [], scalar_prefetch = 0 : i64, scratch_operands = 0 : i64, tpu.core_type = #tpu.core_type<tc>} {
    %c0 = arith.constant 0 : index
    %c0_0 = arith.constant 0 : index
    %0 = vector.load %arg2[%c0, %c0_0] : memref<10x128xf32, #tpu.memory_space<vmem>>, vector<10x128xf32>
    %1 = vector.extract_strided_slice %0 {offsets = [0, 0], sizes = [8, 128], strides = [1, 1]} : vector<10x128xf32> to vector<8x128xf32>
    %2 = vector.extract_strided_slice %0 {offsets = [8, 0], sizes = [1, 128], strides = [1, 1]} : vector<10x128xf32> to vector<1x128xf32>
    %3 = vector.extract_strided_slice %0 {offsets = [9, 0], sizes = [1, 128], strides = [1, 1]} : vector<10x128xf32> to vector<1x128xf32>
    %c0_1 = arith.constant 0 : index
    %c0_2 = arith.constant 0 : index
    %4 = vector.load %arg1[%c0_1, %c0_2] : memref<128x128xf32, #tpu.memory_space<vmem>>, vector<128x128xf32>
    %c0_3 = arith.constant 0 : index
    %c0_4 = arith.constant 0 : index
    %5 = vector.load %arg0[%c0_3, %c0_4] : memref<64x8xf32, #tpu.memory_space<vmem>>, vector<64x8xf32>
    %cst = arith.constant dense<0.000000e+00> : vector<64x128xf32>
    %6 = tpu.matmul %5, %1, %cst {dimension_numbers = #tpu.dot_dimension_numbers<[1], [0], [0], [1], [0, 0, 1, 1], [], []>} : vector<64x8xf32>, vector<8x128xf32>, vector<64x128xf32> -> vector<64x128xf32>
    %7 = vector.broadcast %2 : vector<1x128xf32> to vector<64x128xf32>
    %8 = arith.addf %6, %7 : vector<64x128xf32>
    %cst_5 = arith.constant 0.000000e+00 : f32
    %9 = vector.broadcast %cst_5 : f32 to vector<8x128xf32>
    %10 = vector.extract_strided_slice %8 {offsets = [0, 0], sizes = [8, 128], strides = [1, 1]} : vector<64x128xf32> to vector<8x128xf32>
    %cst_6 = arith.constant dense<0.000000e+00> : vector<8x128xf32>
    %11 = tpu.matmul %9, %4, %cst_6 {dimension_numbers = #tpu.dot_dimension_numbers<[1], [0], [0], [1], [0, 0, 1, 1], [], []>} : vector<8x128xf32>, vector<128x128xf32>, vector<8x128xf32> -> vector<8x128xf32>
    %12 = arith.addf %10, %11 : vector<8x128xf32>
    %13 = math.tanh %12 : vector<8x128xf32>
    %14 = vector.extract_strided_slice %8 {offsets = [8, 0], sizes = [8, 128], strides = [1, 1]} : vector<64x128xf32> to vector<8x128xf32>
    %cst_7 = arith.constant dense<0.000000e+00> : vector<8x128xf32>
    %15 = tpu.matmul %13, %4, %cst_7 {dimension_numbers = #tpu.dot_dimension_numbers<[1], [0], [0], [1], [0, 0, 1, 1], [], []>} : vector<8x128xf32>, vector<128x128xf32>, vector<8x128xf32> -> vector<8x128xf32>
    %16 = arith.addf %14, %15 : vector<8x128xf32>
    %17 = math.tanh %16 : vector<8x128xf32>
    %18 = vector.extract_strided_slice %8 {offsets = [16, 0], sizes = [8, 128], strides = [1, 1]} : vector<64x128xf32> to vector<8x128xf32>
    %cst_8 = arith.constant dense<0.000000e+00> : vector<8x128xf32>
    %19 = tpu.matmul %17, %4, %cst_8 {dimension_numbers = #tpu.dot_dimension_numbers<[1], [0], [0], [1], [0, 0, 1, 1], [], []>} : vector<8x128xf32>, vector<128x128xf32>, vector<8x128xf32> -> vector<8x128xf32>
    %20 = arith.addf %18, %19 : vector<8x128xf32>
    %21 = math.tanh %20 : vector<8x128xf32>
    %22 = vector.extract_strided_slice %8 {offsets = [24, 0], sizes = [8, 128], strides = [1, 1]} : vector<64x128xf32> to vector<8x128xf32>
    %cst_9 = arith.constant dense<0.000000e+00> : vector<8x128xf32>
    %23 = tpu.matmul %21, %4, %cst_9 {dimension_numbers = #tpu.dot_dimension_numbers<[1], [0], [0], [1], [0, 0, 1, 1], [], []>} : vector<8x128xf32>, vector<128x128xf32>, vector<8x128xf32> -> vector<8x128xf32>
    %24 = arith.addf %22, %23 : vector<8x128xf32>
    %25 = math.tanh %24 : vector<8x128xf32>
    %26 = vector.extract_strided_slice %8 {offsets = [32, 0], sizes = [8, 128], strides = [1, 1]} : vector<64x128xf32> to vector<8x128xf32>
    %cst_10 = arith.constant dense<0.000000e+00> : vector<8x128xf32>
    %27 = tpu.matmul %25, %4, %cst_10 {dimension_numbers = #tpu.dot_dimension_numbers<[1], [0], [0], [1], [0, 0, 1, 1], [], []>} : vector<8x128xf32>, vector<128x128xf32>, vector<8x128xf32> -> vector<8x128xf32>
    %28 = arith.addf %26, %27 : vector<8x128xf32>
    %29 = math.tanh %28 : vector<8x128xf32>
    %30 = vector.extract_strided_slice %8 {offsets = [40, 0], sizes = [8, 128], strides = [1, 1]} : vector<64x128xf32> to vector<8x128xf32>
    %cst_11 = arith.constant dense<0.000000e+00> : vector<8x128xf32>
    %31 = tpu.matmul %29, %4, %cst_11 {dimension_numbers = #tpu.dot_dimension_numbers<[1], [0], [0], [1], [0, 0, 1, 1], [], []>} : vector<8x128xf32>, vector<128x128xf32>, vector<8x128xf32> -> vector<8x128xf32>
    %32 = arith.addf %30, %31 : vector<8x128xf32>
    %33 = math.tanh %32 : vector<8x128xf32>
    %34 = vector.extract_strided_slice %8 {offsets = [48, 0], sizes = [8, 128], strides = [1, 1]} : vector<64x128xf32> to vector<8x128xf32>
    %cst_12 = arith.constant dense<0.000000e+00> : vector<8x128xf32>
    %35 = tpu.matmul %33, %4, %cst_12 {dimension_numbers = #tpu.dot_dimension_numbers<[1], [0], [0], [1], [0, 0, 1, 1], [], []>} : vector<8x128xf32>, vector<128x128xf32>, vector<8x128xf32> -> vector<8x128xf32>
    %36 = arith.addf %34, %35 : vector<8x128xf32>
    %37 = math.tanh %36 : vector<8x128xf32>
    %38 = vector.extract_strided_slice %8 {offsets = [56, 0], sizes = [8, 128], strides = [1, 1]} : vector<64x128xf32> to vector<8x128xf32>
    %cst_13 = arith.constant dense<0.000000e+00> : vector<8x128xf32>
    %39 = tpu.matmul %37, %4, %cst_13 {dimension_numbers = #tpu.dot_dimension_numbers<[1], [0], [0], [1], [0, 0, 1, 1], [], []>} : vector<8x128xf32>, vector<128x128xf32>, vector<8x128xf32> -> vector<8x128xf32>
    %40 = arith.addf %38, %39 : vector<8x128xf32>
    %41 = math.tanh %40 : vector<8x128xf32>
    %cst_14 = arith.constant dense<0.000000e+00> : vector<1x8xf32>
    %42 = tpu.matmul %3, %41, %cst_14 {dimension_numbers = #tpu.dot_dimension_numbers<[1], [1], [0], [0], [0, 0, 1, 0], [], []>} : vector<1x128xf32>, vector<8x128xf32>, vector<1x8xf32> -> vector<1x8xf32>
    %c0_15 = arith.constant 0 : index
    %43 = memref.load %arg3[%c0_15] : memref<1xf32, #tpu.memory_space<smem>>
    %44 = vector.broadcast %43 : f32 to vector<1x8xf32>
    %45 = arith.addf %42, %44 : vector<1x8xf32>
    %c0_16 = arith.constant 0 : index
    %c0_17 = arith.constant 0 : index
    %46 = vector.load %arg4[%c0_16, %c0_17] : memref<1x8xf32, #tpu.memory_space<vmem>>, vector<1x8xf32>
    tpu.vector_store %arg4[%c0_16, %c0_17], %45 {strides = array<i32>} : memref<1x8xf32, #tpu.memory_space<vmem>>, vector<1x8xf32>,
    return
  }
}

</mosaic_0001>

<bundles_post_ra>
// kernel: time_rnn_forward.1
= control target key start
LH: loop header
LB: loop body
LE: loop exit
PB: predicated region body
PF: predicated region fallthrough
CT: control target
= control target key end

     0   :  { %10 = vsyncpa [#allocation4], 0  ;;  %s1347_s15 = smov [#allocation3]   ;;  %s1761_s0 = inlined_call_operand.vmem [shape: f32[64,8], index: 0, kind: input, shape index: {}]   ;;  %s1762_s1 = inlined_call_operand.hbm [shape: f32[128,128], index: 1, kind: input, shape index: {}]   ;;  %s1763_s2 = inlined_call_operand.vmem [shape: f32[10,128], index: 2, kind: input, shape index: {}]   ;;  %s1764_s3 = inlined_call_operand.<no memory space> [shape: f32[1], index: 3, kind: input, shape index: {}]   ;;  %s1765_s4 = inlined_call_operand.vmem [shape: f32[1,8], index: 4, kind: output, shape index: {}]  }
   0x1   :  { %s18_s16 = sshll.u32 %s1347_s15, 4  ;;  %s19_s16 = int_to_ptr.vmem [resolvable:$true] %s18_s16 }
   0x2   :  { %s1333_s17 = scalar_lea.vmem %s19_s16, 2048  ;;  %p1338_p1 = scmp.lt.s32.totalorder %s19_s16, %s19_s16 }
   0x3   :  { %p1334_p0 = scmp.ne.s32.totalorder %s19_s16, %s1333_s17  ;;  %p1339_p2 = scmp.lt.s32.totalorder %s1333_s17, %s1333_s17 }
   0x5   :  { %p1340_p3 = por %p1339_p2, %p1338_p1 }
   0x7   :  { %p1341_p4 = pnand %p1340_p3, %p1334_p0 }
   0x9   :  { %1344 = shalt.err (!%p1341_p4)
}
   0xa   :  { %s1348_s18 = smov 128   ;;  %s1349_s19 = smov 8  }
   0xb   :  { %24 = dma.hbm_to_vmem [thread:$0]  %s1762_s1, 2048, %s19_s16, [#allocation4], %s1348_s18, %s1348_s18, %s1349_s19  }
   0xc   :  { %1345 = dma.done.wait [#allocation4], 2048  }
   0xd   :  { %1346 = vsyncadd [#allocation4], 4294965248  ;;  %v1350_v0 = vmov 0.0   ;;  %vm1351_vm0 = vmmov 0   ;;  %v1383_v1 = vld [vmem:[#allocation3 + $0x78] sm:$0xff]  ;;  %v1385_v2 = vld [vmem:[#allocation3 + $0x70] sm:$0xff]  ;;  %v58_v26 = vlaneseq }
   0xe   :  { %1019 = vmatprep.subr.mxu1 %v1350_v0  ;;  %1051 = vmatprep.mubr.msk.f32.mxu1 %vm1351_vm0, %v1350_v0  ;;  %v1389_v3 = vld [vmem:[#allocation3 + $0x68] sm:$0xff]  ;;  %v1393_v4 = vld [vmem:[#allocation3 + $0x60] sm:$0xff]  ;;  %vm62_vm1 = vcmask 64512   ;;  %v1406_v8 = vld [vmem:[#allocation3 + $0x58] sm:$0xff]  ;;  %vm843_vm2 = vcmask 57344  }
   0xf   :  { %1020 = vmatpush3.msra.mxu1 %v1383_v1  ;;  %v32_v5 = vld [vmem:[%s1763_s2] sm:$0xff]  ;;  %v51_v7 = vld [vmem:[%s1761_s0 + $0x8] sm:$0xff]  ;;  %v1411_v9 = vld [vmem:[#allocation3 + $0x50] sm:$0xff]  ;;  %v59_v27 = vshrl.u32 %v58_v26, 7 }
  0x10   :  { %1021 = vmatprep.subr.mxu1 %v1350_v0  ;;  %v50_v6 = vld [vmem:[%s1761_s0] sm:$0xff]  ;;  %1005 = vmatprep.subr.mxu0 %v32_v5  ;;  %v1417_v10 = vld [vmem:[#allocation3 + $0x48] sm:$0xff]  ;;  %v1429_v12 = vld [vmem:[#allocation3 + $0x38] sm:$0xff] }
  0x11   :  { %1022 = vmatpush3.msra.mxu1 %v1385_v2  ;;  %1006 = vmatpush3.msra.mxu0 %v32_v5  ;;  %v1423_v11 = vld [vmem:[#allocation3 + $0x40] sm:$0xff]  ;;  %v1435_v13 = vld [vmem:[#allocation3 + $0x30] sm:$0xff]  ;;  %v1441_v14 = vld [vmem:[#allocation3 + $0x28] sm:$0xff]  ;;  %v60_v28 = vsub.s32 0, %v59_v27 }
  0x12   :  { %1023 = vmatprep.subr.mxu1 %v1350_v0  ;;  %1007 = vmatprep.mubr.msk.f32.mxu0 %vm62_vm1, %v50_v6  ;;  %v1447_v15 = vld [vmem:[#allocation3 + $0x20] sm:$0xff]  ;;  %v1453_v16 = vld [vmem:[#allocation3 + $0x18] sm:$0xff]  ;;  %v1459_v17 = vld [vmem:[#allocation3 + $0x10] sm:$0xff] }
  0x13   :  { %1024 = vmatpush3.msra.mxu1 %v1389_v3  ;;  %1008 = vmatmul.mubr.msk.f32.vlgmr.msra.gmra.mxu0 %vm62_vm1, %v51_v7  ;;  %v1465_v18 = vld [vmem:[#allocation3 + $0x8] sm:$0xff]  ;;  %v1471_v19 = vld [vmem:[#allocation3] sm:$0xff]  ;;  %v52_v20 = vld [vmem:[%s1761_s0 + $0x10] sm:$0xff] }
  0x14   :  { %1025 = vmatprep.subr.mxu1 %v1350_v0  ;;  %1054 = vmatprep.subr.mxu0 %v1350_v0  ;;  %v53_v21 = vld [vmem:[%s1761_s0 + $0x18] sm:$0xff]  ;;  %v54_v22 = vld [vmem:[%s1761_s0 + $0x20] sm:$0xff]  ;;  %v55_v23 = vld [vmem:[%s1761_s0 + $0x28] sm:$0xff] }
  0x15   :  { %1026 = vmatpush3.msra.mxu1 %v1393_v4  ;;  %1055 = vmatpush3.msra.mxu0 %v1383_v1  ;;  %v56_v24 = vld [vmem:[%s1761_s0 + $0x30] sm:$0xff]  ;;  %v57_v25 = vld [vmem:[%s1761_s0 + $0x38] sm:$0xff]  ;;  %v1555_v29 = vld [vmem:[%s1763_s2 + $0x8] sm:$0x3] }
  0x16   :  { %1027 = vmatprep.subr.mxu1 %v1350_v0  ;;  %1056 = vmatprep.subr.mxu0 %v1350_v0  ;;  %v1558_v31 = vrot.slane %v1555_v29, %v60_v28 }
  0x17   :  { %1028 = vmatpush3.msra.mxu1 %v1406_v8  ;;  %1057 = vmatpush3.msra.mxu0 %v1385_v2 }
  0x18   :  { %1029 = vmatprep.subr.mxu1 %v1350_v0  ;;  %1058 = vmatprep.subr.mxu0 %v1350_v0 }
  0x19   :  { %1030 = vmatpush3.msra.mxu1 %v1411_v9  ;;  %1059 = vmatpush3.msra.mxu0 %v1389_v3 }
  0x1a   :  { %1031 = vmatprep.subr.mxu1 %v1350_v0  ;;  %1060 = vmatprep.subr.mxu0 %v1350_v0 }
  0x1b   :  { %1032 = vmatpush3.msra.mxu1 %v1417_v10  ;;  %1061 = vmatpush3.msra.mxu0 %v1393_v4 }
  0x1c   :  { %1033 = vmatprep.subr.mxu1 %v1350_v0  ;;  %1062 = vmatprep.subr.mxu0 %v1350_v0 }
  0x1d   :  { %1034 = vmatpush3.msra.mxu1 %v1423_v11  ;;  %1063 = vmatpush3.msra.mxu0 %v1406_v8 }
  0x1e   :  { %1035 = vmatprep.subr.mxu1 %v1350_v0  ;;  %1064 = vmatprep.subr.mxu0 %v1350_v0 }
  0x1f   :  { %1036 = vmatpush3.msra.mxu1 %v1429_v12  ;;  %1065 = vmatpush3.msra.mxu0 %v1411_v9 }
  0x20   :  { %1037 = vmatprep.subr.mxu1 %v1350_v0  ;;  %1066 = vmatprep.subr.mxu0 %v1350_v0 }
  0x21   :  { %1038 = vmatpush3.msra.mxu1 %v1435_v13  ;;  %1067 = vmatpush3.msra.mxu0 %v1417_v10 }
  0x22   :  { %1039 = vmatprep.subr.mxu1 %v1350_v0  ;;  %1068 = vmatprep.subr.mxu0 %v1350_v0 }
  0x23   :  { %1040 = vmatpush3.msra.mxu1 %v1441_v14  ;;  %1069 = vmatpush3.msra.mxu0 %v1423_v11 }
  0x24   :  { %1041 = vmatprep.subr.mxu1 %v1350_v0  ;;  %1070 = vmatprep.subr.mxu0 %v1350_v0 }
  0x25   :  { %1042 = vmatpush3.msra.mxu1 %v1447_v15  ;;  %1071 = vmatpush3.msra.mxu0 %v1429_v12 }
  0x26   :  { %1043 = vmatprep.subr.mxu1 %v1350_v0  ;;  %1072 = vmatprep.subr.mxu0 %v1350_v0 }
  0x27   :  { %1044 = vmatpush3.msra.mxu1 %v1453_v16  ;;  %1073 = vmatpush3.msra.mxu0 %v1435_v13 }
  0x28   :  { %1045 = vmatprep.subr.mxu1 %v1350_v0  ;;  %1074 = vmatprep.subr.mxu0 %v1350_v0 }
  0x29   :  { %1046 = vmatpush3.msra.mxu1 %v1459_v17  ;;  %1075 = vmatpush3.msra.mxu0 %v1441_v14 }
  0x2a   :  { %1047 = vmatprep.subr.mxu1 %v1350_v0  ;;  %1076 = vmatprep.subr.mxu0 %v1350_v0 }
  0x2b   :  { %1048 = vmatpush3.msra.mxu1 %v1465_v18  ;;  %1077 = vmatpush3.msra.mxu0 %v1447_v15 }
  0x2c   :  { %1049 = vmatprep.subr.mxu1 %v1350_v0  ;;  %1078 = vmatprep.subr.mxu0 %v1350_v0 }
  0x2d   :  { %1050 = vmatpush3.msra.mxu1 %v1471_v19  ;;  %1079 = vmatpush3.msra.mxu0 %v1453_v16 }
  0x2e   :  { %1052 = vmatmul.mubr.f32.vlgmr.msra.gmra.mxu1 %v1350_v0  ;;  %1089 = vmatprep.subr.mxu1 %v1350_v0 }
  0x2f   :  { %1090 = vmatpush3.msra.mxu1 %v1383_v1  ;;  %1080 = vmatprep.subr.mxu0 %v1350_v0 }
  0x30   :  { %1091 = vmatprep.subr.mxu1 %v1350_v0  ;;  %1081 = vmatpush3.msra.mxu0 %v1459_v17 }
  0x31   :  { %1092 = vmatpush3.msra.mxu1 %v1385_v2  ;;  %1082 = vmatprep.subr.mxu0 %v1350_v0 }
  0x32   :  { %1093 = vmatprep.subr.mxu1 %v1350_v0  ;;  %1083 = vmatpush3.msra.mxu0 %v1465_v18 }
  0x33   :  { %1094 = vmatpush3.msra.mxu1 %v1389_v3  ;;  %1084 = vmatprep.subr.mxu0 %v1350_v0 }
  0x34   :  { %1095 = vmatprep.subr.mxu1 %v1350_v0  ;;  %1085 = vmatpush3.msra.mxu0 %v1471_v19 }
  0x35   :  { %1096 = vmatpush3.msra.mxu1 %v1393_v4  ;;  %1121 = vmatprep.mubr.msk.f32.mxu1 %vm1351_vm0, %v1350_v0 }
  0x36   :  { %1097 = vmatprep.subr.mxu1 %v1350_v0  ;;  %1124 = vmatprep.subr.mxu0 %v1350_v0 }
  0x37   :  { %1098 = vmatpush3.msra.mxu1 %v1406_v8  ;;  %1010 = vmatprep.mubr.msk.f32.mxu0 %vm62_vm1, %v52_v20 }
  0x38   :  { %1099 = vmatprep.subr.mxu1 %v1350_v0  ;;  %1011 = vmatmul.mubr.msk.f32.gmra.mxu0 %vm62_vm1, %v53_v21 }
  0x39   :  { %1100 = vmatpush3.msra.mxu1 %v1411_v9  ;;  %1013 = vmatprep.mubr.msk.f32.mxu0 %vm62_vm1, %v54_v22 }
  0x3a   :  { %1101 = vmatprep.subr.mxu1 %v1350_v0 }
  0x3b   :  { %1102 = vmatpush3.msra.mxu1 %v1417_v10 }
  0x3c   :  { %1103 = vmatprep.subr.mxu1 %v1350_v0  ;;  %1014 = vmatmul.mubr.msk.f32.gmra.mxu0 %vm62_vm1, %v55_v23 }
  0x3d   :  { %1104 = vmatpush3.msra.mxu1 %v1423_v11  ;;  %1016 = vmatprep.mubr.msk.f32.mxu0 %vm62_vm1, %v56_v24 }
  0x3e   :  { %1105 = vmatprep.subr.mxu1 %v1350_v0 }
  0x3f   :  { %1106 = vmatpush3.msra.mxu1 %v1429_v12 }
  0x40   :  { %1107 = vmatprep.subr.mxu1 %v1350_v0  ;;  %1017 = vmatmul.mubr.msk.f32.gmra.mxu0 %vm62_vm1, %v57_v25 }
  0x41   :  { %1108 = vmatpush3.msra.mxu1 %v1435_v13  ;;  %1086 = vmatprep.mubr.msk.f32.mxu0 %vm1351_vm0, %v1350_v0 }
  0x42   :  { %1109 = vmatprep.subr.mxu1 %v1350_v0 }
  0x43   :  { %1110 = vmatpush3.msra.mxu1 %v1441_v14 }
  0x44   :  { %1111 = vmatprep.subr.mxu1 %v1350_v0 }
  0x45   :  { %1112 = vmatpush3.msra.mxu1 %v1447_v15 }
  0x46   :  { %1113 = vmatprep.subr.mxu1 %v1350_v0 }
  0x47   :  { %1114 = vmatpush3.msra.mxu1 %v1453_v16 }
  0x48   :  { %1115 = vmatprep.subr.mxu1 %v1350_v0 }
  0x49   :  { %1116 = vmatpush3.msra.mxu1 %v1459_v17 }
  0x4a   :  { %1117 = vmatprep.subr.mxu1 %v1350_v0 }
  0x4b   :  { %1118 = vmatpush3.msra.mxu1 %v1465_v18 }
  0x4c   :  { %1119 = vmatprep.subr.mxu1 %v1350_v0 }
  0x4d   :  { %1120 = vmatpush3.msra.mxu1 %v1471_v19 }
  0x4e   :  { %1159 = vmatprep.subr.mxu1 %v1350_v0 }
  0xd3   :  { %v1009_v30 = vpop.f32.mrf.mxu0 }
  0xd4   :  { %v159_v44 = vadd.f32 %v1009_v30, %v1558_v31 }
  0xd5   :  { %v153_v32 = vpop.f32.mrf.mxu0 }
  0xd6   :  { %v154_v33 = vadd.f32 %v153_v32, %v1558_v31 }
  0xee   :  { %v258_v34 = vpop.f32.mrf.mxu1 }
  0xef   :  { %v262_v35 = vadd.f32 %v258_v34, %v154_v33 }
  0xf0   :  { %v1053_v36 = vpop.f32.mrf.mxu1 }
  0xf1   :  { %1309 = vtanh.f32 %v262_v35 }
  0xf8   :  { %v1595_v38 = vpop.f32.mrf.mxu0 }
  0xf9   :  { %v169_v54 = vadd.f32 %v1595_v38, %v1558_v31 }
  0xfa   :  { %v163_v39 = vpop.f32.mrf.mxu0 }
  0xfb   :  { %v164_v49 = vadd.f32 %v163_v39, %v1558_v31 }
  0xfc   :  { %v1597_v40 = vpop.f32.mrf.mxu0 }
  0xfe   :  { %v1310_v37 = vpop.eup %1309  ;;  %v1599_v41 = vpop.f32.mrf.mxu0 }
  0xff   :  { %1087 = vmatmul.mubr.f32.vlgmr.msra.gmra.mxu0 %v1310_v37  ;;  %v174_v59 = vadd.f32 %v1599_v41, %v1558_v31 }
 0x100   :  { %1125 = vmatpush3.msra.mxu0 %v1383_v1  ;;  %1156 = vmatprep.mubr.msk.f32.mxu0 %vm1351_vm0, %v1350_v0  ;;  %v1601_v42 = vpop.f32.mrf.mxu0 }
 0x101   :  { %1126 = vmatprep.subr.mxu0 %v1350_v0 }
 0x102   :  { %1127 = vmatpush3.msra.mxu0 %v1385_v2  ;;  %v1603_v43 = vpop.f32.mrf.mxu0 }
 0x103   :  { %1128 = vmatprep.subr.mxu0 %v1350_v0  ;;  %v184_v6 = vadd.f32 %v1603_v43, %v1558_v31 }
 0x104   :  { %1129 = vmatpush3.msra.mxu0 %v1389_v3 }
 0x105   :  { %1130 = vmatprep.subr.mxu0 %v1350_v0 }
 0x106   :  { %1131 = vmatpush3.msra.mxu0 %v1393_v4 }
 0x107   :  { %1132 = vmatprep.subr.mxu0 %v1350_v0 }
 0x108   :  { %1133 = vmatpush3.msra.mxu0 %v1406_v8 }
 0x109   :  { %1134 = vmatprep.subr.mxu0 %v1350_v0 }
 0x10a   :  { %1135 = vmatpush3.msra.mxu0 %v1411_v9 }
 0x10b   :  { %1136 = vmatprep.subr.mxu0 %v1350_v0 }
 0x10c   :  { %1137 = vmatpush3.msra.mxu0 %v1417_v10 }
 0x10d   :  { %1138 = vmatprep.subr.mxu0 %v1350_v0 }
 0x10e   :  { %1139 = vmatpush3.msra.mxu0 %v1423_v11 }
 0x10f   :  { %1140 = vmatprep.subr.mxu0 %v1350_v0 }
 0x110   :  { %1141 = vmatpush3.msra.mxu0 %v1429_v12 }
 0x111   :  { %1142 = vmatprep.subr.mxu0 %v1350_v0 }
 0x112   :  { %1143 = vmatpush3.msra.mxu0 %v1435_v13 }
 0x113   :  { %1144 = vmatprep.subr.mxu0 %v1350_v0 }
 0x114   :  { %1145 = vmatpush3.msra.mxu0 %v1441_v14 }
 0x115   :  { %1146 = vmatprep.subr.mxu0 %v1350_v0 }
 0x116   :  { %1147 = vmatpush3.msra.mxu0 %v1447_v15 }
 0x117   :  { %1148 = vmatprep.subr.mxu0 %v1350_v0 }
 0x118   :  { %1149 = vmatpush3.msra.mxu0 %v1453_v16 }
 0x119   :  { %1150 = vmatprep.subr.mxu0 %v1350_v0 }
 0x11a   :  { %1151 = vmatpush3.msra.mxu0 %v1459_v17 }
 0x11b   :  { %1152 = vmatprep.subr.mxu0 %v1350_v0 }
 0x11c   :  { %1153 = vmatpush3.msra.mxu0 %v1465_v18 }
 0x11d   :  { %1154 = vmatprep.subr.mxu0 %v1350_v0 }
 0x11e   :  { %1155 = vmatpush3.msra.mxu0 %v1471_v19 }
 0x11f   :  { %1194 = vmatprep.subr.mxu0 %v1350_v0 }
 0x1bf   :  { %v330_v45 = vpop.f32.mrf.mxu0 }
 0x1c0   :  { %v334_v46 = vadd.f32 %v330_v45, %v159_v44 }
 0x1c1   :  { %v1088_v47 = vpop.f32.mrf.mxu0 }
 0x1c2   :  { %1311 = vtanh.f32 %v334_v46 }
 0x1cf   :  { %v1312_v48 = vpop.eup %1311 }
 0x1d0   :  { %1122 = vmatmul.mubr.f32.vlgmr.msra.gmra.mxu1 %v1312_v48 }
 0x1d1   :  { %1160 = vmatpush3.msra.mxu1 %v1383_v1  ;;  %1191 = vmatprep.mubr.msk.f32.mxu1 %vm1351_vm0, %v1350_v0 }
 0x1d2   :  { %1161 = vmatprep.subr.mxu1 %v1350_v0 }
 0x1d3   :  { %1162 = vmatpush3.msra.mxu1 %v1385_v2 }
 0x1d4   :  { %1163 = vmatprep.subr.mxu1 %v1350_v0 }
 0x1d5   :  { %1164 = vmatpush3.msra.mxu1 %v1389_v3 }
 0x1d6   :  { %1165 = vmatprep.subr.mxu1 %v1350_v0 }
 0x1d7   :  { %1166 = vmatpush3.msra.mxu1 %v1393_v4 }
 0x1d8   :  { %1167 = vmatprep.subr.mxu1 %v1350_v0 }
 0x1d9   :  { %1168 = vmatpush3.msra.mxu1 %v1406_v8 }
 0x1da   :  { %1169 = vmatprep.subr.mxu1 %v1350_v0 }
 0x1db   :  { %1170 = vmatpush3.msra.mxu1 %v1411_v9 }
 0x1dc   :  { %1171 = vmatprep.subr.mxu1 %v1350_v0 }
 0x1dd   :  { %1172 = vmatpush3.msra.mxu1 %v1417_v10 }
 0x1de   :  { %1173 = vmatprep.subr.mxu1 %v1350_v0 }
 0x1df   :  { %1174 = vmatpush3.msra.mxu1 %v1423_v11 }
 0x1e0   :  { %1175 = vmatprep.subr.mxu1 %v1350_v0 }
 0x1e1   :  { %1176 = vmatpush3.msra.mxu1 %v1429_v12 }
 0x1e2   :  { %1177 = vmatprep.subr.mxu1 %v1350_v0 }
 0x1e3   :  { %1178 = vmatpush3.msra.mxu1 %v1435_v13 }
 0x1e4   :  { %1179 = vmatprep.subr.mxu1 %v1350_v0 }
 0x1e5   :  { %1180 = vmatpush3.msra.mxu1 %v1441_v14 }
 0x1e6   :  { %1181 = vmatprep.subr.mxu1 %v1350_v0 }
 0x1e7   :  { %1182 = vmatpush3.msra.mxu1 %v1447_v15 }
 0x1e8   :  { %1183 = vmatprep.subr.mxu1 %v1350_v0 }
 0x1e9   :  { %1184 = vmatpush3.msra.mxu1 %v1453_v16 }
 0x1ea   :  { %1185 = vmatprep.subr.mxu1 %v1350_v0 }
 0x1eb   :  { %1186 = vmatpush3.msra.mxu1 %v1459_v17 }
 0x1ec   :  { %1187 = vmatprep.subr.mxu1 %v1350_v0 }
 0x1ed   :  { %1188 = vmatpush3.msra.mxu1 %v1465_v18 }
 0x1ee   :  { %1189 = vmatprep.subr.mxu1 %v1350_v0 }
 0x1ef   :  { %1190 = vmatpush3.msra.mxu1 %v1471_v19 }
 0x1f0   :  { %1229 = vmatprep.subr.mxu1 %v1350_v0 }
 0x290   :  { %v402_v50 = vpop.f32.mrf.mxu1 }
 0x291   :  { %v406_v51 = vadd.f32 %v402_v50, %v164_v49 }
 0x292   :  { %v1123_v52 = vpop.f32.mrf.mxu1 }
 0x293   :  { %1313 = vtanh.f32 %v406_v51 }
 0x2a0   :  { %v1314_v53 = vpop.eup %1313 }
 0x2a1   :  { %1157 = vmatmul.mubr.f32.vlgmr.msra.gmra.mxu0 %v1314_v53 }
 0x2a2   :  { %1195 = vmatpush3.msra.mxu0 %v1383_v1  ;;  %1226 = vmatprep.mubr.msk.f32.mxu0 %vm1351_vm0, %v1350_v0 }
 0x2a3   :  { %1196 = vmatprep.subr.mxu0 %v1350_v0 }
 0x2a4   :  { %1197 = vmatpush3.msra.mxu0 %v1385_v2 }
 0x2a5   :  { %1198 = vmatprep.subr.mxu0 %v1350_v0 }
 0x2a6   :  { %1199 = vmatpush3.msra.mxu0 %v1389_v3 }
 0x2a7   :  { %1200 = vmatprep.subr.mxu0 %v1350_v0 }
 0x2a8   :  { %1201 = vmatpush3.msra.mxu0 %v1393_v4 }
 0x2a9   :  { %1202 = vmatprep.subr.mxu0 %v1350_v0 }
 0x2aa   :  { %1203 = vmatpush3.msra.mxu0 %v1406_v8 }
 0x2ab   :  { %1204 = vmatprep.subr.mxu0 %v1350_v0 }
 0x2ac   :  { %1205 = vmatpush3.msra.mxu0 %v1411_v9 }
 0x2ad   :  { %1206 = vmatprep.subr.mxu0 %v1350_v0 }
 0x2ae   :  { %1207 = vmatpush3.msra.mxu0 %v1417_v10 }
 0x2af   :  { %1208 = vmatprep.subr.mxu0 %v1350_v0 }
 0x2b0   :  { %1209 = vmatpush3.msra.mxu0 %v1423_v11 }
 0x2b1   :  { %1210 = vmatprep.subr.mxu0 %v1350_v0 }
 0x2b2   :  { %1211 = vmatpush3.msra.mxu0 %v1429_v12 }
 0x2b3   :  { %1212 = vmatprep.subr.mxu0 %v1350_v0 }
 0x2b4   :  { %1213 = vmatpush3.msra.mxu0 %v1435_v13 }
 0x2b5   :  { %1214 = vmatprep.subr.mxu0 %v1350_v0 }
 0x2b6   :  { %1215 = vmatpush3.msra.mxu0 %v1441_v14 }
 0x2b7   :  { %1216 = vmatprep.subr.mxu0 %v1350_v0 }
 0x2b8   :  { %1217 = vmatpush3.msra.mxu0 %v1447_v15 }
 0x2b9   :  { %1218 = vmatprep.subr.mxu0 %v1350_v0 }
 0x2ba   :  { %1219 = vmatpush3.msra.mxu0 %v1453_v16 }
 0x2bb   :  { %1220 = vmatprep.subr.mxu0 %v1350_v0 }
 0x2bc   :  { %1221 = vmatpush3.msra.mxu0 %v1459_v17 }
 0x2bd   :  { %1222 = vmatprep.subr.mxu0 %v1350_v0 }
 0x2be   :  { %1223 = vmatpush3.msra.mxu0 %v1465_v18 }
 0x2bf   :  { %1224 = vmatprep.subr.mxu0 %v1350_v0 }
 0x2c0   :  { %1225 = vmatpush3.msra.mxu0 %v1471_v19 }
 0x2c1   :  { %1264 = vmatprep.subr.mxu0 %v1350_v0 }
 0x361   :  { %v474_v55 = vpop.f32.mrf.mxu0 }
 0x362   :  { %v478_v56 = vadd.f32 %v474_v55, %v169_v54 }
 0x363   :  { %v1158_v57 = vpop.f32.mrf.mxu0 }
 0x364   :  { %1315 = vtanh.f32 %v478_v56 }
 0x371   :  { %v1316_v58 = vpop.eup %1315 }
 0x372   :  { %1192 = vmatmul.mubr.f32.vlgmr.msra.gmra.mxu1 %v1316_v58 }
 0x373   :  { %1230 = vmatpush3.msra.mxu1 %v1383_v1  ;;  %1261 = vmatprep.mubr.msk.f32.mxu1 %vm1351_vm0, %v1350_v0 }
 0x374   :  { %1231 = vmatprep.subr.mxu1 %v1350_v0 }
 0x375   :  { %1232 = vmatpush3.msra.mxu1 %v1385_v2 }
 0x376   :  { %1233 = vmatprep.subr.mxu1 %v1350_v0 }
 0x377   :  { %1234 = vmatpush3.msra.mxu1 %v1389_v3 }
 0x378   :  { %1235 = vmatprep.subr.mxu1 %v1350_v0 }
 0x379   :  { %1236 = vmatpush3.msra.mxu1 %v1393_v4 }
 0x37a   :  { %1237 = vmatprep.subr.mxu1 %v1350_v0 }
 0x37b   :  { %1238 = vmatpush3.msra.mxu1 %v1406_v8 }
 0x37c   :  { %1239 = vmatprep.subr.mxu1 %v1350_v0 }
 0x37d   :  { %1240 = vmatpush3.msra.mxu1 %v1411_v9 }
 0x37e   :  { %1241 = vmatprep.subr.mxu1 %v1350_v0 }
 0x37f   :  { %1242 = vmatpush3.msra.mxu1 %v1417_v10 }
 0x380   :  { %1243 = vmatprep.subr.mxu1 %v1350_v0 }
 0x381   :  { %1244 = vmatpush3.msra.mxu1 %v1423_v11 }
 0x382   :  { %1245 = vmatprep.subr.mxu1 %v1350_v0 }
 0x383   :  { %1246 = vmatpush3.msra.mxu1 %v1429_v12 }
 0x384   :  { %1247 = vmatprep.subr.mxu1 %v1350_v0 }
 0x385   :  { %1248 = vmatpush3.msra.mxu1 %v1435_v13 }
 0x386   :  { %1249 = vmatprep.subr.mxu1 %v1350_v0 }
 0x387   :  { %1250 = vmatpush3.msra.mxu1 %v1441_v14 }
 0x388   :  { %1251 = vmatprep.subr.mxu1 %v1350_v0 }
 0x389   :  { %1252 = vmatpush3.msra.mxu1 %v1447_v15 }
 0x38a   :  { %1253 = vmatprep.subr.mxu1 %v1350_v0 }
 0x38b   :  { %1254 = vmatpush3.msra.mxu1 %v1453_v16 }
 0x38c   :  { %1255 = vmatprep.subr.mxu1 %v1350_v0 }
 0x38d   :  { %1256 = vmatpush3.msra.mxu1 %v1459_v17 }
 0x38e   :  { %1257 = vmatprep.subr.mxu1 %v1350_v0 }
 0x38f   :  { %1258 = vmatpush3.msra.mxu1 %v1465_v18 }
 0x390   :  { %1259 = vmatprep.subr.mxu1 %v1350_v0 }
 0x391   :  { %1260 = vmatpush3.msra.mxu1 %v1471_v19 }
 0x392   :  { %1299 = vmatprep.subr.mxu1 %v1350_v0 }
 0x432   :  { %v546_v60 = vpop.f32.mrf.mxu1 }
 0x433   :  { %v550_v61 = vadd.f32 %v546_v60, %v174_v59 }
 0x434   :  { %v1193_v62 = vpop.f32.mrf.mxu1 }
 0x435   :  { %1317 = vtanh.f32 %v550_v61 }
 0x442   :  { %v1318_v63 = vpop.eup %1317 }
 0x443   :  { %1227 = vmatmul.mubr.f32.vlgmr.msra.gmra.mxu0 %v1318_v63 }
 0x444   :  { %1265 = vmatpush3.msra.mxu0 %v1383_v1  ;;  %1296 = vmatprep.mubr.msk.f32.mxu0 %vm1351_vm0, %v1350_v0  ;;  %v179_v1 = vadd.f32 %v1597_v40, %v1558_v31 }
 0x445   :  { %1266 = vmatprep.subr.mxu0 %v1350_v0 }
 0x446   :  { %1267 = vmatpush3.msra.mxu0 %v1385_v2 }
 0x447   :  { %1268 = vmatprep.subr.mxu0 %v1350_v0 }
 0x448   :  { %1269 = vmatpush3.msra.mxu0 %v1389_v3 }
 0x449   :  { %1270 = vmatprep.subr.mxu0 %v1350_v0 }
 0x44a   :  { %1271 = vmatpush3.msra.mxu0 %v1393_v4 }
 0x44b   :  { %1272 = vmatprep.subr.mxu0 %v1350_v0 }
 0x44c   :  { %1273 = vmatpush3.msra.mxu0 %v1406_v8 }
 0x44d   :  { %1274 = vmatprep.subr.mxu0 %v1350_v0 }
 0x44e   :  { %1275 = vmatpush3.msra.mxu0 %v1411_v9 }
 0x44f   :  { %1276 = vmatprep.subr.mxu0 %v1350_v0 }
 0x450   :  { %1277 = vmatpush3.msra.mxu0 %v1417_v10 }
 0x451   :  { %1278 = vmatprep.subr.mxu0 %v1350_v0 }
 0x452   :  { %1279 = vmatpush3.msra.mxu0 %v1423_v11  ;;  %v189_v11 = vadd.f32 %v1601_v42, %v1558_v31 }
 0x453   :  { %1280 = vmatprep.subr.mxu0 %v1350_v0 }
 0x454   :  { %1281 = vmatpush3.msra.mxu0 %v1429_v12 }
 0x455   :  { %1282 = vmatprep.subr.mxu0 %v1350_v0 }
 0x456   :  { %1283 = vmatpush3.msra.mxu0 %v1435_v13 }
 0x457   :  { %1284 = vmatprep.subr.mxu0 %v1350_v0 }
 0x458   :  { %1285 = vmatpush3.msra.mxu0 %v1441_v14 }
 0x459   :  { %1286 = vmatprep.subr.mxu0 %v1350_v0 }
 0x45a   :  { %1287 = vmatpush3.msra.mxu0 %v1447_v15 }
 0x45b   :  { %1288 = vmatprep.subr.mxu0 %v1350_v0 }
 0x45c   :  { %1289 = vmatpush3.msra.mxu0 %v1453_v16  ;;  %v771_v16 = vrot.slane %v1555_v29, 1 }
 0x45d   :  { %1290 = vmatprep.subr.mxu0 %v1350_v0 }
 0x45e   :  { %1291 = vmatpush3.msra.mxu0 %v1459_v17 }
 0x45f   :  { %1292 = vmatprep.subr.mxu0 %v1350_v0 }
 0x460   :  { %1293 = vmatpush3.msra.mxu0 %v1465_v18 }
 0x461   :  { %1294 = vmatprep.subr.mxu0 %v1350_v0 }
 0x462   :  { %1295 = vmatpush3.msra.mxu0 %v1471_v19 }
 0x503   :  { %v618_v2 = vpop.f32.mrf.mxu0 }
 0x504   :  { %v622_v3 = vadd.f32 %v618_v2, %v179_v1 }
 0x505   :  { %v1228_v4 = vpop.f32.mrf.mxu0 }
 0x506   :  { %1319 = vtanh.f32 %v622_v3 }
 0x513   :  { %v1320_v5 = vpop.eup %1319 }
 0x514   :  { %1262 = vmatmul.mubr.f32.vlgmr.msra.gmra.mxu1 %v1320_v5 }
 0x515   :  { %1301 = vmatprep.mubr.msk.f32.mxu1 %vm1351_vm0, %v1350_v0  ;;  %v769_v0 = vstv %s1764_s3 }
 0x5d4   :  { %v690_v7 = vpop.f32.mrf.mxu1 }
 0x5d5   :  { %v694_v8 = vadd.f32 %v690_v7, %v184_v6 }
 0x5d6   :  { %v1263_v9 = vpop.f32.mrf.mxu1 }
 0x5d7   :  { %1321 = vtanh.f32 %v694_v8 }
 0x5e4   :  { %v1322_v10 = vpop.eup %1321 }
 0x5e5   :  { %1297 = vmatmul.mubr.f32.vlgmr.msra.gmra.mxu0 %v1322_v10 }
 0x6a5   :  { %v762_v12 = vpop.f32.mrf.mxu0 }
 0x6a6   :  { %v766_v13 = vadd.f32 %v762_v12, %v189_v11 }
 0x6a7   :  { %v1298_v14 = vpop.f32.mrf.mxu0 }
 0x6a8   :  { %1323 = vtanh.f32 %v766_v13 }
 0x6b5   :  { %v1324_v15 = vpop.eup %1323 }
 0x6b6   :  { %1300 = vmatpush3.xpose.msra.mxu1 %v1324_v15 }
 0x6b9   :  { %1302 = vmatmul.mubr.f32.vlgmr.msra.gmra.mxu1 %v771_v16 }
 0x779   :  { %v839_v17 = vpop.f32.mrf.mxu1 }
 0x77a   :  { %v840_v18 = vadd.f32 %v839_v17, %v769_v0 }
 0x77b   :  { %v1303_v19 = vpop.f32.mrf.mxu1 }
 0x77c   :  { %844 = vst.msk [vmem:[%s1765_s4] sm:$0x1] %vm843_vm2, %v840_v18 }
 0x77d   :  { %849 = vsyncpa [#allocation4], 1 }

</bundles_post_ra>
